<compile_context>
chip_gen: v5e
topology: v5e:2x2
jax: 0.10.0
libtpu: 0.0.40
codegen_flags: <defaults>
</compile_context>

<pallas_src>
import functools

import jax
import jax.numpy as jnp
from jax import lax
from jax.experimental import pallas as pl
from jax.experimental.pallas import tpu as pltpu

_MIB = 1024 * 1024


def _round_up(x, m):
    return ((x + m - 1) // m) * m


def _tpu_budgets():
    """(per-input f32 block bytes, vmem_limit_bytes), sized per TPU generation."""
    try:
        vmem_cap = int(pltpu.get_tpu_info().vmem_capacity_bytes)
    except Exception:
        vmem_cap = 64 * _MIB                     # conservative (v7x-like) fallback
    if vmem_cap >= 96 * _MIB:                    # v5e / v6e: 128 MiB physical VMEM
        return 8 * _MIB, 72 * _MIB
    return 4 * _MIB, 48 * _MIB                   # v7x: 64 MiB physical VMEM


def _dice_loss_kernel(pred_ref, targ_ref, out_ref, inter_acc, denom_acc, *,
                      valid_rows, valid_cols, row_block, col_block):
    ri = pl.program_id(0)
    ci = pl.program_id(1)
    last_c = pl.num_programs(1) - 1

    @pl.when(ci == 0)
    def _():
        inter_acc[...] = jnp.zeros_like(inter_acc)
        denom_acc[...] = jnp.zeros_like(denom_acc)

    # Upcast (possibly bf16) inputs to f32; exp/recip of sigmoid go to the EUP.
    p = jax.nn.sigmoid(pred_ref[...].astype(jnp.float32))
    t = targ_ref[...].astype(jnp.float32)

    col_ragged = (valid_cols % col_block) != 0

    if col_ragged:
        # Only the last column block contains out-of-bounds (garbage) lanes;
        # gate the mask there so interior steps carry zero masking cost.
        @pl.when(ci == last_c)
        def _():
            col_ids = (lax.broadcasted_iota(jnp.int32, (row_block, col_block), 1)
                       + ci * col_block)
            keep = col_ids < valid_cols
            # jnp.where (not multiply-by-mask) so NaN garbage in OOB lanes
            # cannot poison the sums.
            inter_acc[...] += jnp.sum(jnp.where(keep, p * t, 0.0),
                                      axis=1, keepdims=True)
            denom_acc[...] += jnp.sum(jnp.where(keep, p + t, 0.0),
                                      axis=1, keepdims=True)

        @pl.when(ci != last_c)
        def _():
            inter_acc[...] += jnp.sum(p * t, axis=1, keepdims=True)
            denom_acc[...] += jnp.sum(p + t, axis=1, keepdims=True)
    else:
        inter_acc[...] += jnp.sum(p * t, axis=1, keepdims=True)
        denom_acc[...] += jnp.sum(p + t, axis=1, keepdims=True)

    @pl.when(ci == last_c)
    def _():
        inter = inter_acc[...]                      # (rb, 1)
        denom = denom_acc[...]                      # (rb, 1)
        # Real rows always have denom > 0 (sigmoid > 0).  Garbage / padded
        # rows (possibly NaN) are guarded here and zeroed just below.
        denom = jnp.where(denom > 0.0, denom, 1.0)
        dice = 2.0 * inter / denom                  # (rb, 1)
        if (valid_rows % row_block) != 0:
            row_ids = (lax.broadcasted_iota(jnp.int32, (row_block, 1), 0)
                       + ri * row_block)
            dice = jnp.where(row_ids < valid_rows, dice, 0.0)
        # Per-row-block partial dice sum on a lane-dense tile so the row grid
        # axis stays "parallel" (each block owns its own output tile).
        out_ref[...] = jnp.full((1, 8, 128), jnp.sum(dice), dtype=jnp.float32)


def dice_loss(pred, target, *, narrow_target=True):
    """Pallas TPU DiceLoss.  pred, target: (B, C, H, W).  Returns scalar f32."""
    B, C, H, W = pred.shape
    rows = B * C
    cols = H * W

    pred2 = pred.reshape(rows, cols)
    targ2 = target.reshape(rows, cols)
    # Dice targets are 0/1 masks: bf16 represents them exactly and halves the
    # target's HBM read traffic inside the (bandwidth-bound) kernel.
    if narrow_target and targ2.dtype == jnp.float32:
        targ2 = targ2.astype(jnp.bfloat16)

    block_bytes, vmem_limit = _tpu_budgets()

    # ---- tile selection ----
    # Row block: multiple of 16 (bf16 sublane packing), <= rows; when rows
    # allow, keep >= 2 row blocks so the "parallel" row axis can shard across
    # v7x's two TensorCores.  Otherwise use the full row extent (always legal).
    sub = 16 if (targ2.dtype != jnp.float32 or pred2.dtype != jnp.float32) else 8
    if rows >= 2 * sub:
        rb = min(max(((rows // 2) // sub) * sub, sub), 512)
    else:
        rb = rows
    n_rb = pl.cdiv(rows, rb)

    # Column block: lane-dense multiple of 128, sized so one f32 pred block is
    # ~block_bytes, split evenly over the column axis (no dead padded columns).
    cb = max(128, (block_bytes // (rb * 4)) // 128 * 128)
    n_cb = pl.cdiv(cols, cb)
    cb = _round_up(pl.cdiv(cols, n_cb), 128)
    if cb >= cols:
        cb, n_cb = cols, 1                 # full column extent: always legal
    else:
        n_cb = pl.cdiv(cols, cb)

    kernel = functools.partial(_dice_loss_kernel,
                               valid_rows=rows, valid_cols=cols,
                               row_block=rb, col_block=cb)

    out = pl.pallas_call(
        kernel,
        out_shape=jax.ShapeDtypeStruct((n_rb, 8, 128), jnp.float32),
        grid_spec=pltpu.PrefetchScalarGridSpec(
            num_scalar_prefetch=0,
            grid=(n_rb, n_cb),                      # reduction (cols) axis last
            in_specs=[
                pl.BlockSpec((rb, cb), lambda i, j: (i, j)),
                pl.BlockSpec((rb, cb), lambda i, j: (i, j)),
            ],
            out_specs=pl.BlockSpec((1, 8, 128), lambda i, j: (i, 0, 0)),
            scratch_shapes=[
                pltpu.VMEM((rb, 1), jnp.float32),   # per-row intersection
                pltpu.VMEM((rb, 1), jnp.float32),   # per-row sum(p + t)
            ],
        ),
        compiler_params=pltpu.CompilerParams(
            dimension_semantics=("parallel", "arbitrary"),
            vmem_limit_bytes=vmem_limit,
        ),
    )(pred2, targ2)

    # Finalize: sum of per-block dice sums divided by the true row count.
    return 1.0 - jnp.sum(out[:, 0, 0]) / jnp.float32(rows)


def dice_loss_ref(pred, target):
    p = jax.nn.sigmoid(pred)
    inter = jnp.sum(p * target, axis=(2, 3))
    dice = 2.0 * inter / (jnp.sum(p, axis=(2, 3)) + jnp.sum(target, axis=(2, 3)))
    return 1.0 - jnp.mean(dice)


if __name__ == "__main__":
    key = jax.random.PRNGKey(0)
    k1, k2 = jax.random.split(key)

    B, C, H, W = 2, 4, 16, 16
    pred = jax.random.normal(k1, (B, C, H, W), dtype=jnp.float32)
    # binary segmentation-style mask target
    target = (jax.random.uniform(k2, (B, C, H, W)) > 0.5).astype(jnp.float32)

    loss = jax.block_until_ready(jax.jit(dice_loss)(pred, target))
    ref = jax.block_until_ready(dice_loss_ref(pred, target))

    assert jnp.allclose(loss, ref, atol=1e-5, rtol=1e-5), (loss, ref)
    print("KERNEL_OK")
</pallas_src>

<mosaic_0001>
module attributes {stable_mosaic.version = 11 : i64} {
  func.func @_dice_loss_kernel(%arg0: i32, %arg1: i32, %arg2: memref<8x256xf32, #tpu.memory_space<vmem>>, %arg3: memref<8x256xbf16, #tpu.memory_space<vmem>>, %arg4: memref<1x8x128xf32, #tpu.memory_space<vmem>>, %arg5: memref<8x1xf32, #tpu.memory_space<vmem>>, %arg6: memref<8x1xf32, #tpu.memory_space<vmem>>) attributes {dimension_semantics = [#tpu.dimension_semantics<parallel>, #tpu.dimension_semantics<arbitrary>], iteration_bounds = array<i64: 1, 1>, scalar_prefetch = 0 : i64, scratch_operands = 2 : i64, tpu.core_type = #tpu.core_type<tc>, window_params = [{transform_indices = @transform_0, window_bounds = array<i64: 8, 256>}, {transform_indices = @transform_1, window_bounds = array<i64: 8, 256>}, {transform_indices = @transform_2, window_bounds = array<i64: 1, 8, 128>}]} {
    %c0_i32 = arith.constant 0 : i32
    %0 = arith.cmpi eq, %arg1, %c0_i32 : i32
    %1 = arith.extui %0 : i1 to i32
    %c0_i32_0 = arith.constant 0 : i32
    %2 = arith.cmpi ne, %1, %c0_i32_0 : i32
    scf.if %2 {
      %cst_16 = arith.constant 0.000000e+00 : f32
      %26 = vector.broadcast %cst_16 : f32 to vector<8x1xf32>
      %c0_17 = arith.constant 0 : index
      %c0_18 = arith.constant 0 : index
      %27 = vector.load %arg5[%c0_17, %c0_18] : memref<8x1xf32, #tpu.memory_space<vmem>>, vector<8x1xf32>
      tpu.vector_store %arg5[%c0_17, %c0_18], %26 {strides = array<i32>} : memref<8x1xf32, #tpu.memory_space<vmem>>, vector<8x1xf32>,
      %cst_19 = arith.constant 0.000000e+00 : f32
      %28 = vector.broadcast %cst_19 : f32 to vector<8x1xf32>
      %c0_20 = arith.constant 0 : index
      %c0_21 = arith.constant 0 : index
      %29 = vector.load %arg6[%c0_20, %c0_21] : memref<8x1xf32, #tpu.memory_space<vmem>>, vector<8x1xf32>
      tpu.vector_store %arg6[%c0_20, %c0_21], %28 {strides = array<i32>} : memref<8x1xf32, #tpu.memory_space<vmem>>, vector<8x1xf32>,
    } else {
    }
    %c0 = arith.constant 0 : index
    %c0_1 = arith.constant 0 : index
    %3 = vector.load %arg2[%c0, %c0_1] : memref<8x256xf32, #tpu.memory_space<vmem>>, vector<8x256xf32>
    %4 = arith.negf %3 : vector<8x256xf32>
    %5 = math.exp %4 : vector<8x256xf32>
    %cst = arith.constant 1.000000e+00 : f32
    %6 = vector.broadcast %cst : f32 to vector<8x256xf32>
    %7 = arith.addf %6, %5 : vector<8x256xf32>
    %8 = arith.divf %6, %7 : vector<8x256xf32>
    %c0_2 = arith.constant 0 : index
    %c0_3 = arith.constant 0 : index
    %9 = vector.load %arg3[%c0_2, %c0_3] : memref<8x256xbf16, #tpu.memory_space<vmem>>, vector<8x256xbf16>
    %10 = arith.extf %9 : vector<8x256xbf16> to vector<8x256xf32>
    %c0_4 = arith.constant 0 : index
    %c0_5 = arith.constant 0 : index
    %11 = vector.load %arg5[%c0_4, %c0_5] : memref<8x1xf32, #tpu.memory_space<vmem>>, vector<8x1xf32>
    %12 = arith.mulf %8, %10 : vector<8x256xf32>
    %cst_6 = arith.constant dense<0.000000e+00> : vector<8xf32>
    %13 = vector.multi_reduction <add>, %12, %cst_6 [1] : vector<8x256xf32> to vector<8xf32>
    %14 = vector.shape_cast %13 : vector<8xf32> to vector<8x1xf32>
    %15 = arith.addf %11, %14 : vector<8x1xf32>
    %c0_7 = arith.constant 0 : index
    %c0_8 = arith.constant 0 : index
    %16 = vector.load %arg5[%c0_7, %c0_8] : memref<8x1xf32, #tpu.memory_space<vmem>>, vector<8x1xf32>
    tpu.vector_store %arg5[%c0_7, %c0_8], %15 {strides = array<i32>} : memref<8x1xf32, #tpu.memory_space<vmem>>, vector<8x1xf32>,
    %c0_9 = arith.constant 0 : index
    %c0_10 = arith.constant 0 : index
    %17 = vector.load %arg6[%c0_9, %c0_10] : memref<8x1xf32, #tpu.memory_space<vmem>>, vector<8x1xf32>
    %18 = arith.addf %8, %10 : vector<8x256xf32>
    %cst_11 = arith.constant dense<0.000000e+00> : vector<8xf32>
    %19 = vector.multi_reduction <add>, %18, %cst_11 [1] : vector<8x256xf32> to vector<8xf32>
    %20 = vector.shape_cast %19 : vector<8xf32> to vector<8x1xf32>
    %21 = arith.addf %17, %20 : vector<8x1xf32>
    %c0_12 = arith.constant 0 : index
    %c0_13 = arith.constant 0 : index
    %22 = vector.load %arg6[%c0_12, %c0_13] : memref<8x1xf32, #tpu.memory_space<vmem>>, vector<8x1xf32>
    tpu.vector_store %arg6[%c0_12, %c0_13], %21 {strides = array<i32>} : memref<8x1xf32, #tpu.memory_space<vmem>>, vector<8x1xf32>,
    %c0_i32_14 = arith.constant 0 : i32
    %23 = arith.cmpi eq, %arg1, %c0_i32_14 : i32
    %24 = arith.extui %23 : i1 to i32
    %c0_i32_15 = arith.constant 0 : i32
    %25 = arith.cmpi ne, %24, %c0_i32_15 : i32
    scf.if %25 {
      %c0_16 = arith.constant 0 : index
      %c0_17 = arith.constant 0 : index
      %26 = vector.load %arg5[%c0_16, %c0_17] : memref<8x1xf32, #tpu.memory_space<vmem>>, vector<8x1xf32>
      %c0_18 = arith.constant 0 : index
      %c0_19 = arith.constant 0 : index
      %27 = vector.load %arg6[%c0_18, %c0_19] : memref<8x1xf32, #tpu.memory_space<vmem>>, vector<8x1xf32>
      %cst_20 = arith.constant 0.000000e+00 : f32
      %28 = vector.broadcast %cst_20 : f32 to vector<8x1xf32>
      %29 = arith.cmpf ogt, %27, %28 : vector<8x1xf32>
      %cst_21 = arith.constant 1.000000e+00 : f32
      %30 = vector.broadcast %cst_21 : f32 to vector<8x1xf32>
      %31 = arith.select %29, %27, %30 : vector<8x1xi1>, vector<8x1xf32>
      %cst_22 = arith.constant 2.000000e+00 : f32
      %32 = vector.broadcast %cst_22 : f32 to vector<8x1xf32>
      %33 = arith.mulf %32, %26 : vector<8x1xf32>
      %34 = arith.divf %33, %31 : vector<8x1xf32>
      %35 = vector.shape_cast %34 : vector<8x1xf32> to vector<1x8x1xf32>
      %cst_23 = arith.constant dense<0.000000e+00> : vector<1xf32>
      %36 = vector.multi_reduction <add>, %35, %cst_23 [1, 2] : vector<1x8x1xf32> to vector<1xf32>
      %37 = vector.shape_cast %36 : vector<1xf32> to vector<1x1x1xf32>
      %38 = vector.extract %37[0, 0, 0] : f32 from vector<1x1x1xf32>
      %39 = vector.broadcast %38 : f32 to vector<1x8x128xf32>
      %c0_24 = arith.constant 0 : index
      %c0_25 = arith.constant 0 : index
      %c0_26 = arith.constant 0 : index
      %40 = vector.load %arg4[%c0_24, %c0_25, %c0_26] : memref<1x8x128xf32, #tpu.memory_space<vmem>>, vector<1x8x128xf32>
      tpu.vector_store %arg4[%c0_24, %c0_25, %c0_26], %39 {strides = array<i32>} : memref<1x8x128xf32, #tpu.memory_space<vmem>>, vector<1x8x128xf32>,
    } else {
    }
    return
  }
  func.func @transform_0(%arg0: i32, %arg1: i32) -> (i32, i32) {
    %c0_i32 = arith.constant 0 : i32
    return %arg0, %arg1 : i32, i32
  }
  func.func @transform_1(%arg0: i32, %arg1: i32) -> (i32, i32) {
    %c0_i32 = arith.constant 0 : i32
    return %arg0, %arg1 : i32, i32
  }
  func.func @transform_2(%arg0: i32, %arg1: i32) -> (i32, i32, i32) {
    %c0_i32 = arith.constant 0 : i32
    %c0_i32_0 = arith.constant 0 : i32
    %c0_i32_1 = arith.constant 0 : i32
    return %arg0, %c0_i32, %c0_i32_0 : i32, i32, i32
  }
}

</mosaic_0001>

<bundles_post_ra>
// kernel: dice_loss.1
= control target key start
LH: loop header
LB: loop body
LE: loop exit
PB: predicated region body
PF: predicated region fallthrough
CT: control target
= control target key end

     0   :  { %vm15_vm0 = vcmask 7168   ;;  %v132_v8 = vmov 0.0   ;;  %s165_s0 = inlined_call_operand.vmem [shape: f32[8,256], index: 0, kind: input, shape index: {}]   ;;  %s166_s1 = inlined_call_operand.vmem [shape: bf16[8,256], index: 1, kind: input, shape index: {}]   ;;  %s167_s2 = inlined_call_operand.vmem [shape: f32[1,8,128], index: 2, kind: output, shape index: {}]  }
   0x1   :  { %v18_v0 = vld [vmem:[%s165_s0] sm:$0xff]  ;;  %v19_v1 = vld [vmem:[%s165_s0 + $0x8] sm:$0xff]  ;;  %17 = vst.msk [vmem:[#allocation3] sm:$0xff] %vm15_vm0, %v132_v8 }
   0x2   :  { %v117_v2 = vmul.f32 -1.442695, %v18_v0  ;;  %v118_v3 = vmul.f32 -1.442695, %v19_v1  ;;  %16 = vst.msk [vmem:[#allocation2] sm:$0xff] %vm15_vm0, %v132_v8  ;;  %v58_v19 = vld [vmem:[%s166_s1] sm:$0xff] }
   0x3   :  { %v59_v25 = vunpack.c.l.bf16 %v58_v19  ;;  %v60_v27 = vunpack.c.h.bf16 %v58_v19 }
   0x4   :  { %122 = vpow2.f32 %v117_v2 }
   0x5   :  { %124 = vpow2.f32 %v118_v3 }
   0x8   :  { %v70_v38 = vld [vmem:[#allocation3] sm:$0xff] }
   0x9   :  { %v61_v41 = vld [vmem:[#allocation2] sm:$0xff] }
   0xa   :  { %v123_v4 = vpop.eup %122 }
   0xb   :  { %v125_v5 = vpop.eup %124  ;;  %v26_v6 = vadd.f32 1.0, %v123_v4 }
   0xc   :  { %v27_v7 = vadd.f32 1.0, %v125_v5 }
   0xd   :  { %126 = vrcp.f32 %v26_v6  ;;  %vm33_vm1 = vweird.f32 %v26_v6  ;;  %v39_v12 = vand.u32 2147483648, %v26_v6  ;;  %v37_v15 = vand.u32 2147483647, %v26_v6 }
   0xe   :  { %128 = vrcp.f32 %v27_v7  ;;  %v54_v16 = vand.u32 2147483648, %v27_v7  ;;  %vm48_vm3 = vweird.f32 %v27_v7  ;;  %v52_v18 = vand.u32 2147483647, %v27_v7 }
   0xf   :  { %v40_v21 = vor.u32 1.1754944e-38, %v39_v12  ;;  %vm38_vm6 = vcmp.eq.f32.partialorder %v37_v15, 8.507059e+37 }
  0x10   :  { %v55_v24 = vor.u32 1.1754944e-38, %v54_v16  ;;  %vm53_vm8 = vcmp.eq.f32.partialorder %v52_v18, 8.507059e+37 }
  0x13   :  { %v127_v9 = vpop.eup %126 }
  0x14   :  { %v129_v10 = vpop.eup %128  ;;  %v29_v11 = vmul.f32 %v127_v9, %v26_v6  ;;  %vm34_vm2 = vweird.f32 %v127_v9 }
  0x15   :  { %v44_v13 = vmul.f32 %v129_v10, %v27_v7  ;;  %vm49_vm4 = vweird.f32 %v129_v10  ;;  %vm35_vm5 = vmor %vm33_vm1, %vm34_vm2 }
  0x16   :  { %v30_v14 = vsub.f32 1.0, %v29_v11  ;;  %vm50_vm7 = vmor %vm48_vm3, %vm49_vm4 }
  0x17   :  { %v45_v17 = vsub.f32 1.0, %v44_v13 }
  0x18   :  { %v31_v20 = vmul.f32 %v127_v9, %v30_v14 }
  0x19   :  { %v46_v22 = vmul.f32 %v129_v10, %v45_v17 }
  0x1a   :  { %v32_v23 = vadd.f32 %v127_v9, %v31_v20 }
  0x1b   :  { %v47_v26 = vadd.f32 %v129_v10, %v46_v22 }
  0x1c   :  { %v36_v28 = vsel %vm35_vm5, %v127_v9, %v32_v23 }
  0x1d   :  { %v41_v29 = vsel %vm38_vm6, %v40_v21, %v36_v28  ;;  %v51_v30 = vsel %vm50_vm7, %v129_v10, %v47_v26 }
  0x1e   :  { %v56_v31 = vsel %vm53_vm8, %v55_v24, %v51_v30  ;;  %v71_v32 = vadd.f32 %v59_v25, %v41_v29  ;;  %v62_v35 = vmul.f32 %v59_v25, %v41_v29 }
  0x1f   :  { %v72_v33 = vadd.f32 %v60_v27, %v56_v31  ;;  %v63_v36 = vmul.f32 %v60_v27, %v56_v31 }
  0x21   :  { %v73_v34 = vadd.f32 %v72_v33, %v71_v32  ;;  %v64_v37 = vadd.f32 %v63_v36, %v62_v35 }
  0x23   :  { %74 = vadd.xlane.f32.xlu0 %v73_v34 }
  0x2b   :  { %65 = vadd.xlane.f32.xlu0 %v64_v37 }
  0x96   :  { %v75_v39 = vpop.xlane.xlu0 %74 }
  0x97   :  { %v76_v40 = vadd.f32 %v75_v39, %v70_v38 }
  0x99   :  { %77 = vst.msk [vmem:[#allocation3] sm:$0xff] %vm15_vm0, %v76_v40 }
  0x9e   :  { %v66_v42 = vpop.xlane.xlu0 %65 }
  0x9f   :  { %v67_v43 = vadd.f32 %v66_v42, %v61_v41 }
  0xa0   :  { %v82_v44 = vld [vmem:[#allocation3] sm:$0xff] }
  0xa1   :  { %69 = vst.msk [vmem:[#allocation2] sm:$0xff] %vm15_vm0, %v67_v43  ;;  %vm83_vm9 = vcmp.gt.f32.partialorder %v82_v44, 0.0 }
  0xa2   :  { %v84_v45 = vsel %vm83_vm9, %v82_v44, 1.0 }
  0xa3   :  { %130 = vrcp.f32 %v84_v45  ;;  %v97_v50 = vand.u32 2147483648, %v84_v45  ;;  %v95_v52 = vand.u32 2147483647, %v84_v45  ;;  %vm91_vm11 = vweird.f32 %v84_v45 }
  0xa5   :  { %v98_v55 = vor.u32 1.1754944e-38, %v97_v50  ;;  %vm96_vm13 = vcmp.eq.f32.partialorder %v95_v52, 8.507059e+37 }
  0xa8   :  { %v81_v49 = vld [vmem:[#allocation2] sm:$0xff] }
  0xa9   :  { %v131_v46 = vpop.eup %130  ;;  %v85_v53 = vmul.f32 2.0, %v81_v49 }
  0xaa   :  { %v87_v47 = vmul.f32 %v131_v46, %v84_v45  ;;  %vm92_vm10 = vweird.f32 %v131_v46 }
  0xab   :  { %vm93_vm12 = vmor %vm91_vm11, %vm92_vm10 }
  0xac   :  { %v88_v48 = vsub.f32 1.0, %v87_v47 }
  0xae   :  { %v89_v51 = vmul.f32 %v131_v46, %v88_v48 }
  0xb0   :  { %v90_v54 = vadd.f32 %v131_v46, %v89_v51 }
  0xb2   :  { %v94_v56 = vsel %vm93_vm12, %v131_v46, %v90_v54 }
  0xb3   :  { %v99_v57 = vsel %vm96_vm13, %v98_v55, %v94_v56 }
  0xb4   :  { %v100_v58 = vmul.f32 %v99_v57, %v85_v53 }
  0xb6   :  { %v101_v59 = vsel %vm15_vm0, %v100_v58, 0.0 }
  0xb7   :  { %102 = vadd.xlane.f32.xlu1 %v101_v59 }
 0x12a   :  { %v103_v60 = vpop.xlane.xlu1 %102 }
 0x12b   :  { %v104_v61 = vrot.slane %v103_v60, 4 }
 0x12d   :  { %v105_v62 = vadd.f32 %v104_v61, %v103_v60 }
 0x12f   :  { %v106_v63 = vrot.slane %v105_v62, 2 }
 0x131   :  { %v107_v0 = vadd.f32 %v106_v63, %v105_v62 }
 0x133   :  { %v108_v1 = vrot.slane %v107_v0, 1 }
 0x135   :  { %v109_v2 = vadd.f32 %v108_v1, %v107_v0 }
 0x137   :  { %119 = vpush %v109_v2 }
 0x168   :  { %s120_s1 = spop %119 }
 0x169   :  { %v111_v3 = vstv %s120_s1 }
 0x16a   :  { %112 = vst [vmem:[%s167_s2] sm:$0xff] %v111_v3 }

</bundles_post_ra>
